<compile_context>
chip_gen: v6e
topology: v6e:2x2x1
jax: 0.10.0
libtpu: 0.0.40
codegen_flags: <defaults>
</compile_context>

<pallas_src>
import jax
import jax.numpy as jnp
from jax.experimental import pallas as pl
from jax.experimental.pallas import tpu as pltpu


def _make_fused_mlp_kernel(num_layers):
    """Build a kernel with signature: kernel(x_ref, *(w_ref, shift_ref)*L, o_ref)."""

    def kernel(x_ref, *refs):
        o_ref = refs[-1]
        layer_refs = refs[:-1]
        # Per-batch activations, transposed: (C, H*W); pixels on lanes.
        h = x_ref[...].astype(jnp.float32)
        for l in range(num_layers):
            w = layer_refs[2 * l][...]          # (Cout, Cin), BN scale pre-folded
            shift = layer_refs[2 * l + 1][...]  # (Cout, 1),  folded BN shift
            cin = w.shape[1]
            if cin < 8:
                # Degenerate contraction depth (<4% MXU utilization): do it as
                # `cin` unrolled broadcast multiply-adds on the idle VPU slots.
                acc = w[:, 0:1].astype(jnp.float32) * h[0:1, :]
                for c in range(1, cin):
                    acc = acc + w[:, c:c + 1].astype(jnp.float32) * h[c:c + 1, :]
            else:
                # MXU path: bf16 inputs, f32 accumulation.
                acc = jnp.dot(w, h.astype(w.dtype),
                              preferred_element_type=jnp.float32)
            h = jnp.maximum(acc + shift, 0.0)       # BN shift + ReLU epilogue
        o_ref[...] = h.astype(o_ref.dtype)

    return kernel


def mlp_forward(x_nchw, params):
    """Fused MLP forward.  x_nchw: (N, C, H, W); params: list of (w_scaled, shift)."""
    N, C, H, W = x_nchw.shape
    HW = H * W
    x3 = x_nchw.reshape(N, C, HW)        # contiguous reshape, no transpose / HBM pass

    num_layers = len(params)
    cout_last = params[-1][0].shape[0]

    in_specs = [pl.BlockSpec((None, C, HW), lambda n: (n, 0, 0))]
    args = [x3]
    for (w, shift) in params:
        cout, cin = w.shape
        in_specs.append(pl.BlockSpec((cout, cin), lambda n: (0, 0)))
        in_specs.append(pl.BlockSpec((cout, 1), lambda n: (0, 0)))
        args.append(w)
        args.append(shift)

    out3 = pl.pallas_call(
        _make_fused_mlp_kernel(num_layers),
        out_shape=jax.ShapeDtypeStruct((N, cout_last, HW), x_nchw.dtype),
        grid_spec=pltpu.PrefetchScalarGridSpec(
            num_scalar_prefetch=0,
            grid=(N,),                    # >= 2 parallel steps -> both v7x TCs
            in_specs=in_specs,
            out_specs=pl.BlockSpec((None, cout_last, HW), lambda n: (n, 0, 0)),
        ),
        compiler_params=pltpu.CompilerParams(
            dimension_semantics=("parallel",)),
    )(*args)
    return out3.reshape(N, cout_last, H, W)


def init_params(key, in_channels, out_channels, eps=1e-5):
    """Deterministic synthetic parameters matching the PyTorch module shapes.

    Conv2d(cin, cout, 1, bias=False) weight (cout, cin, 1, 1) is stored as
    (cout, cin); inference-mode BatchNorm2d is folded to scale/shift and the
    scale is fused into the conv weight.  Layers that take the MXU path store
    their weight in bf16 (f32 accumulation inside the kernel).
    """
    channels = [in_channels] + list(out_channels)
    params = []
    for i in range(1, len(channels)):
        cin, cout = channels[i - 1], channels[i]
        key, kw, kg, kb, km, kv = jax.random.split(key, 6)
        bound = 1.0 / jnp.sqrt(cin)
        w = jax.random.uniform(kw, (cout, cin), jnp.float32, -bound, bound)
        gamma = jax.random.uniform(kg, (cout,), jnp.float32, 0.5, 1.5)
        beta = jax.random.uniform(kb, (cout,), jnp.float32, -0.5, 0.5)
        r_mean = jax.random.uniform(km, (cout,), jnp.float32, -0.5, 0.5)
        r_var = jax.random.uniform(kv, (cout,), jnp.float32, 0.5, 1.5)
        scale = gamma / jnp.sqrt(r_var + eps)
        shift = beta - r_mean * scale
        w_scaled = w * scale[:, None]                       # fold BN scale into weight
        w_dtype = jnp.float32 if cin < 8 else jnp.bfloat16  # VPU layer stays f32
        params.append((w_scaled.astype(w_dtype),
                       shift.reshape(cout, 1).astype(jnp.float32)))
    return params


def mlp_reference(x_nchw, params, exact_dtypes=True):
    """Pure-JAX reference.  exact_dtypes=True mirrors the kernel's bf16 matmul
    inputs (tight check); False runs everything in f32 (semantic check)."""
    N, C, H, W = x_nchw.shape
    h = x_nchw.reshape(N, C, H * W).astype(jnp.float32)
    for (w, shift) in params:
        if exact_dtypes and w.dtype == jnp.bfloat16:
            h_in = h.astype(jnp.bfloat16).astype(jnp.float32)
        else:
            h_in = h
        acc = jnp.einsum("oc,nct->not", w.astype(jnp.float32), h_in)
        h = jnp.maximum(acc + shift[None, :, :], 0.0)
    return h.reshape(N, -1, H, W)


if __name__ == "__main__":
    key = jax.random.PRNGKey(0)
    k_x, k_p = jax.random.split(key)

    # MLP(in_channels=4, out_channels=[32, 16], activation='relu', dropout=0)
    # dropout=0 in this config; training-mode dropout / BN stat updates are
    # out of scope for the inference forward pass implemented here.
    in_channels = 4
    out_channels = [32, 16]
    N, H, W = 2, 16, 16

    x = jax.random.normal(k_x, (N, in_channels, H, W), jnp.float32)
    params = init_params(k_p, in_channels, out_channels)

    out = jax.block_until_ready(mlp_forward(x, params))
    assert out.shape == (N, out_channels[-1], H, W)

    # Tight check vs a reference that mirrors the kernel's mixed precision.
    ref = jax.block_until_ready(mlp_reference(x, params, exact_dtypes=True))
    assert jnp.allclose(out, ref, atol=1e-4, rtol=1e-4), \
        float(jnp.max(jnp.abs(out - ref)))

    # Loose check vs a full-f32 reference (only bf16 matmul rounding differs).
    ref_f32 = jax.block_until_ready(mlp_reference(x, params, exact_dtypes=False))
    assert jnp.allclose(out, ref_f32, atol=5e-2, rtol=5e-2)

    print("KERNEL_OK")
</pallas_src>

<mosaic_0001>
module attributes {stable_mosaic.version = 11 : i64} {
  func.func @kernel(%arg0: i32, %arg1: memref<1x4x256xf32, #tpu.memory_space<vmem>>, %arg2: memref<32x4xf32, #tpu.memory_space<vmem>>, %arg3: memref<32x1xf32, #tpu.memory_space<vmem>>, %arg4: memref<16x32xbf16, #tpu.memory_space<vmem>>, %arg5: memref<16x1xf32, #tpu.memory_space<vmem>>, %arg6: memref<1x16x256xf32, #tpu.memory_space<vmem>>) attributes {dimension_semantics = [#tpu.dimension_semantics<parallel>], iteration_bounds = array<i64: 2>, scalar_prefetch = 0 : i64, scratch_operands = 0 : i64, tpu.core_type = #tpu.core_type<tc>, window_params = [{transform_indices = @transform_0, window_bounds = array<i64: 1, 4, 256>}, {pipeline_mode = #tpu.pipeline_mode<synchronous>, transform_indices = @transform_1, window_bounds = array<i64: 32, 4>}, {pipeline_mode = #tpu.pipeline_mode<synchronous>, transform_indices = @transform_2, window_bounds = array<i64: 32, 1>}, {pipeline_mode = #tpu.pipeline_mode<synchronous>, transform_indices = @transform_3, window_bounds = array<i64: 16, 32>}, {pipeline_mode = #tpu.pipeline_mode<synchronous>, transform_indices = @transform_4, window_bounds = array<i64: 16, 1>}, {transform_indices = @transform_5, window_bounds = array<i64: 1, 16, 256>}]} {
    %c0 = arith.constant 0 : index
    %c0_0 = arith.constant 0 : index
    %c0_1 = arith.constant 0 : index
    %0 = vector.load %arg1[%c0, %c0_0, %c0_1] : memref<1x4x256xf32, #tpu.memory_space<vmem>>, vector<1x4x256xf32>
    %1 = vector.shape_cast %0 : vector<1x4x256xf32> to vector<4x256xf32>
    %c0_2 = arith.constant 0 : index
    %c0_3 = arith.constant 0 : index
    %2 = vector.load %arg2[%c0_2, %c0_3] : memref<32x4xf32, #tpu.memory_space<vmem>>, vector<32x4xf32>
    %c0_4 = arith.constant 0 : index
    %c0_5 = arith.constant 0 : index
    %3 = vector.load %arg3[%c0_4, %c0_5] : memref<32x1xf32, #tpu.memory_space<vmem>>, vector<32x1xf32>
    %4 = vector.extract_strided_slice %2 {offsets = [0, 0], sizes = [32, 1], strides = [1, 1]} : vector<32x4xf32> to vector<32x1xf32>
    %5 = vector.extract_strided_slice %1 {offsets = [0, 0], sizes = [1, 256], strides = [1, 1]} : vector<4x256xf32> to vector<1x256xf32>
    %6 = vector.broadcast %4 : vector<32x1xf32> to vector<32x256xf32>
    %7 = vector.broadcast %5 : vector<1x256xf32> to vector<32x256xf32>
    %8 = arith.mulf %6, %7 : vector<32x256xf32>
    %9 = vector.extract_strided_slice %2 {offsets = [0, 1], sizes = [32, 1], strides = [1, 1]} : vector<32x4xf32> to vector<32x1xf32>
    %10 = vector.extract_strided_slice %1 {offsets = [1, 0], sizes = [1, 256], strides = [1, 1]} : vector<4x256xf32> to vector<1x256xf32>
    %11 = vector.broadcast %9 : vector<32x1xf32> to vector<32x256xf32>
    %12 = vector.broadcast %10 : vector<1x256xf32> to vector<32x256xf32>
    %13 = arith.mulf %11, %12 : vector<32x256xf32>
    %14 = arith.addf %8, %13 : vector<32x256xf32>
    %15 = vector.extract_strided_slice %2 {offsets = [0, 2], sizes = [32, 1], strides = [1, 1]} : vector<32x4xf32> to vector<32x1xf32>
    %16 = vector.extract_strided_slice %1 {offsets = [2, 0], sizes = [1, 256], strides = [1, 1]} : vector<4x256xf32> to vector<1x256xf32>
    %17 = vector.broadcast %15 : vector<32x1xf32> to vector<32x256xf32>
    %18 = vector.broadcast %16 : vector<1x256xf32> to vector<32x256xf32>
    %19 = arith.mulf %17, %18 : vector<32x256xf32>
    %20 = arith.addf %14, %19 : vector<32x256xf32>
    %21 = vector.extract_strided_slice %2 {offsets = [0, 3], sizes = [32, 1], strides = [1, 1]} : vector<32x4xf32> to vector<32x1xf32>
    %22 = vector.extract_strided_slice %1 {offsets = [3, 0], sizes = [1, 256], strides = [1, 1]} : vector<4x256xf32> to vector<1x256xf32>
    %23 = vector.broadcast %21 : vector<32x1xf32> to vector<32x256xf32>
    %24 = vector.broadcast %22 : vector<1x256xf32> to vector<32x256xf32>
    %25 = arith.mulf %23, %24 : vector<32x256xf32>
    %26 = arith.addf %20, %25 : vector<32x256xf32>
    %27 = vector.broadcast %3 : vector<32x1xf32> to vector<32x256xf32>
    %28 = arith.addf %26, %27 : vector<32x256xf32>
    %cst = arith.constant 0.000000e+00 : f32
    %29 = vector.broadcast %cst : f32 to vector<32x256xf32>
    %30 = arith.maximumf %28, %29 : vector<32x256xf32>
    %c0_6 = arith.constant 0 : index
    %c0_7 = arith.constant 0 : index
    %31 = vector.load %arg4[%c0_6, %c0_7] : memref<16x32xbf16, #tpu.memory_space<vmem>>, vector<16x32xbf16>
    %c0_8 = arith.constant 0 : index
    %c0_9 = arith.constant 0 : index
    %32 = vector.load %arg5[%c0_8, %c0_9] : memref<16x1xf32, #tpu.memory_space<vmem>>, vector<16x1xf32>
    %33 = arith.truncf %30 : vector<32x256xf32> to vector<32x256xbf16>
    %cst_10 = arith.constant dense<0.000000e+00> : vector<16x256xf32>
    %34 = tpu.matmul %31, %33, %cst_10 {dimension_numbers = #tpu.dot_dimension_numbers<[1], [0], [0], [1], [0, 0, 1, 1], [], []>} : vector<16x32xbf16>, vector<32x256xbf16>, vector<16x256xf32> -> vector<16x256xf32>
    %35 = vector.broadcast %32 : vector<16x1xf32> to vector<16x256xf32>
    %36 = arith.addf %34, %35 : vector<16x256xf32>
    %cst_11 = arith.constant 0.000000e+00 : f32
    %37 = vector.broadcast %cst_11 : f32 to vector<16x256xf32>
    %38 = arith.maximumf %36, %37 : vector<16x256xf32>
    %c0_12 = arith.constant 0 : index
    %c0_13 = arith.constant 0 : index
    %c0_14 = arith.constant 0 : index
    %39 = vector.load %arg6[%c0_12, %c0_13, %c0_14] : memref<1x16x256xf32, #tpu.memory_space<vmem>>, vector<1x16x256xf32>
    %40 = vector.shape_cast %39 : vector<1x16x256xf32> to vector<16x256xf32>
    %41 = vector.shape_cast %38 : vector<16x256xf32> to vector<1x16x256xf32>
    tpu.vector_store %arg6[%c0_12, %c0_13, %c0_14], %41 {strides = array<i32>} : memref<1x16x256xf32, #tpu.memory_space<vmem>>, vector<1x16x256xf32>,
    return
  }
  func.func @transform_0(%arg0: i32) -> (i32, i32, i32) {
    %c0_i32 = arith.constant 0 : i32
    %c0_i32_0 = arith.constant 0 : i32
    %c0_i32_1 = arith.constant 0 : i32
    return %arg0, %c0_i32, %c0_i32_0 : i32, i32, i32
  }
  func.func @transform_1(%arg0: i32) -> (i32, i32) {
    %c0_i32 = arith.constant 0 : i32
    %c0_i32_0 = arith.constant 0 : i32
    %c0_i32_1 = arith.constant 0 : i32
    return %c0_i32, %c0_i32_0 : i32, i32
  }
  func.func @transform_2(%arg0: i32) -> (i32, i32) {
    %c0_i32 = arith.constant 0 : i32
    %c0_i32_0 = arith.constant 0 : i32
    %c0_i32_1 = arith.constant 0 : i32
    return %c0_i32, %c0_i32_0 : i32, i32
  }
  func.func @transform_3(%arg0: i32) -> (i32, i32) {
    %c0_i32 = arith.constant 0 : i32
    %c0_i32_0 = arith.constant 0 : i32
    %c0_i32_1 = arith.constant 0 : i32
    return %c0_i32, %c0_i32_0 : i32, i32
  }
  func.func @transform_4(%arg0: i32) -> (i32, i32) {
    %c0_i32 = arith.constant 0 : i32
    %c0_i32_0 = arith.constant 0 : i32
    %c0_i32_1 = arith.constant 0 : i32
    return %c0_i32, %c0_i32_0 : i32, i32
  }
  func.func @transform_5(%arg0: i32) -> (i32, i32, i32) {
    %c0_i32 = arith.constant 0 : i32
    %c0_i32_0 = arith.constant 0 : i32
    %c0_i32_1 = arith.constant 0 : i32
    return %arg0, %c0_i32, %c0_i32_0 : i32, i32, i32
  }
}

</mosaic_0001>

<bundles_post_ra>
// kernel: tpu_custom_call.1
= control target key start
LH: loop header
LB: loop body
LE: loop exit
PB: predicated region body
PF: predicated region fallthrough
CT: control target
= control target key end

     0   :  { %10 = vsyncpa [#allocation3], 0  ;;  %s931_s0 = inlined_call_operand.vmem [shape: f32[2,4,256], index: 0, kind: input, shape index: {}]   ;;  %s932_s1 = inlined_call_operand.vmem [shape: f32[32,4], index: 1, kind: input, shape index: {}]   ;;  %s933_s2 = inlined_call_operand.vmem [shape: f32[32,1], index: 2, kind: input, shape index: {}]   ;;  %s934_s3 = inlined_call_operand.vmem [shape: bf16[16,32], index: 3, kind: input, shape index: {}]   ;;  %s935_s4 = inlined_call_operand.vmem [shape: f32[16,1], index: 4, kind: input, shape index: {}]   ;;  %s936_s5 = inlined_call_operand.hbm [shape: f32[2,16,256], index: 5, kind: output, shape index: {}]  }
   0x1   :  { %12 = vsyncpa [#allocation3 + $0x1], 0  ;;  %s792_s18 = smov 0   ;;  %s794_s19 = smov 0  }
   0x2   :  { %s796_s20 = smov 0   ;;  %s798_s21 = smov 0  }
   0x3 LB: > { %s813_s22 = sadd.s32 4294967295, %s753_s21   ;;  %s620_s23 = sadd.s32 4294967294, %s753_s21   ;;  %s753_s21 = sphi %s798_s21, %s942_s21   ;;  %s749_s20 = sphi %s796_s20, %s941_s20   ;;  %s745_s19 = sphi %s794_s19, %s940_s19   ;;  %s741_s18 = sphi %s792_s18, %s939_s18  }
   0x4   : > { %s817_s24 = sadd.s32 1, %s753_s21   ;;  %s135_s25 = sadd.s32 1, %s749_s20 }
   0x5   : > { %s132_s26 = ssub.s32 %s753_s21, %s817_s24  ;;  %p145_p0 = scmp.ne.s32.totalorder %s749_s20, %s745_s19 }
   0x6   : > { %p133_p1 = scmp.eq.s32.totalorder %s132_s26, 0  ;;  %p146_p2 = scmp.eq.s32.totalorder %s813_s22, 1 }
   0x7   : > { %p151_p3 = scmp.ne.s32.totalorder %s745_s19, %s741_s18  ;;  %p152_p4 = scmp.eq.s32.totalorder %s620_s23, 1 }
   0x8   : > { %s828_s27 = scalar_select %p133_p1, %s749_s20, %s135_s25  }
   0x9   : > { %p830_p5 = por %p146_p2, %p145_p0  ;;  %p834_p6 = por %p152_p4, %p151_p3 }
   0xa   : > { %p623_p7 = scmp.ge.s32.totalorder %s753_s21, 1  ;;  %p190_p8 = scmp.lt.s32.totalorder %s753_s21, 3 }
   0xc   : > { %p191_p9 = pnand %p623_p7, %p190_p8 }
   0xd   : > { %p218_p10 = scmp.lt.s32.totalorder (!%p191_p9), %s813_s22, 1  ;;  %s215_s16 = sand.u32 (!%p191_p9), 1, %s745_s19  }
   0xe   : > { %194 = sbr.rel (%p191_p9) target bundleno = 423 (0x1a7), region = 40  ;;  %s624_s17 = sshll.u32 (!%p191_p9), %s215_s16, 5 }
   0xf   : > { %s217_s23 = scalar_lea.vmem (!%p191_p9), [#allocation2], %s624_s17  ;;  %s635_s26 = sshll.u32 (!%p191_p9), %s813_s22, 9 }
  0x10   : > { %s558_s25 = sshll.u32 (!%p191_p9), %s217_s23, 4  ;;  %s889_s7 = scalar_lea.hbm (!%p191_p9), %s936_s5, %s635_s26  ;;  %s884_s25 = int_to_ptr.vmem [resolvable:$true] %s558_s25 }
  0x11   : > { %s891_s8 = scalar_lea.sflag (!%p191_p9), [#allocation3], %s215_s16 }
  0x13   : > { %v227_v0 = vld [vmem:[%s932_s1 + $0x10] sm:$0xff]  ;;  %v755_v1 = vmov 3   ;;  %v756_v2 = vmov 1   ;;  %v228_v3 = vld [vmem:[%s932_s1 + $0x18] sm:$0xff]  ;;  %v757_v4 = vmov 0   ;;  %v758_v5 = vmov 2  }
  0x14   : > { %685 = vset.pattern.permute.xlu0 %v755_v1  ;;  %681 = vset.pattern.permute.xlu1 %v756_v2  ;;  %v226_v6 = vld [vmem:[%s932_s1 + $0x8] sm:$0xff]  ;;  %v225_v7 = vld [vmem:[%s932_s1] sm:$0xff]  ;;  %v231_v8 = vld [vmem:[%s933_s2 + $0x10] sm:$0xff]  ;;  %s219_s9 = scalar_select %p218_p10, %s813_s22, 1  ;;  %v254_v19 = vlaneseq  ;;  %vm489_vm0 = vcmask 261120  }
  0x15   : > { %389 = vperm.xlu0 %685, %v227_v0   ;;  %289 = vperm.xlu1 %681, %v227_v0   ;;  %v230_v9 = vld [vmem:[%s933_s2 + $0x8] sm:$0xff]  ;;  %v232_v11 = vld [vmem:[%s933_s2 + $0x18] sm:$0xff]  ;;  %v229_v12 = vld [vmem:[%s933_s2] sm:$0xff]  ;;  %s693_s22 = scalar_lea.vmem %s884_s25, 512 }
  0x16   : > { %525 = vmatprep.mubr.bf16.mxu0 %v757_v4  ;;  %v469_v10 = vld [vmem:[%s935_s4 + $0x8] sm:$0xff]  ;;  %v468_v13 = vld [vmem:[%s935_s4] sm:$0xff]  ;;  %s634_s10 = sshll.u32 %s219_s9, 3  ;;  %v255_v21 = vshrl.u32 %v254_v19, 7  ;;  %p694_p11 = scmp.ne.s32.totalorder %s884_s25, %s693_s22 }
  0x17   : > { %s222_s13 = scalar_lea.vmem %s931_s0, %s634_s10  ;;  %s759_s9 = smov [#allocation2]  }
  0x18   : > { %v256_v23 = vsub.s32 0, %v255_v21  ;;  %v260_v24 = vsub.s32 4, %v255_v21  ;;  %v298_v25 = vsub.s32 1, %v255_v21  ;;  %v302_v26 = vsub.s32 5, %v255_v21  ;;  %v224_v28 = vld [vmem:[%s222_s13] sm:$0xff]  ;;  %p695_p12 = pnand %p694_p11, %p830_p5  ;;  %s697_s10 = sshll.u32 %s759_s9, 4  ;;  %s698_s10 = int_to_ptr.vmem [resolvable:$false] %s697_s10 }
  0x19   : > { %686 = vset.pattern.permute.xlu0 %v758_v5  ;;  %293 = vperm.xlu1 %681, %v228_v3   ;;  %v348_v34 = vsub.s32 2, %v255_v21  ;;  %v352_v35 = vsub.s32 6, %v255_v21  ;;  %v398_v37 = vsub.s32 3, %v255_v21  ;;  %v402_v38 = vsub.s32 7, %v255_v21  ;;  %s699_s11 = scalar_lea.vmem %s698_s10, 1024  ;;  %p700_p0 = scmp.lt.s32.totalorder %s884_s25, %s698_s10 }
  0x1a   : > { %339 = vperm.xlu0 %686, %v227_v0   ;;  %v257_v30 = vrot.slane %v224_v28, %v256_v23  ;;  %v261_v31 = vrot.slane %v224_v28, %v260_v24  ;;  %v299_v32 = vrot.slane %v224_v28, %v298_v25  ;;  %v303_v33 = vrot.slane %v224_v28, %v302_v26  ;;  %p696_p13 = pneg %p695_p12  ;;  %p701_p1 = scmp.lt.s32.totalorder %s699_s11, %s693_s22 }
  0x1b   : > { %v349_v43 = vrot.slane %v224_v28, %v348_v34  ;;  %v353_v44 = vrot.slane %v224_v28, %v352_v35  ;;  %v399_v46 = vrot.slane %v224_v28, %v398_v37  ;;  %v403_v47 = vrot.slane %v224_v28, %v402_v38 }
  0x1c   : > { %v267_v39 = vrot.slane %v257_v30, %v256_v23  ;;  %v271_v40 = vrot.slane %v261_v31, %v256_v23  ;;  %v309_v41 = vrot.slane %v299_v32, %v298_v25  ;;  %v313_v42 = vrot.slane %v303_v33, %v298_v25  ;;  %p702_p2 = por %p701_p1, %p700_p0 }
  0x1d   : > { %682 = vset.pattern.permute.xlu1 %v758_v5  ;;  %v359_v53 = vrot.slane %v349_v43, %v348_v34  ;;  %v363_v54 = vrot.slane %v353_v44, %v348_v34  ;;  %v409_v55 = vrot.slane %v399_v46, %v398_v37  ;;  %v413_v56 = vrot.slane %v403_v47, %v398_v37 }
  0x1e   : > { %343 = vperm.xlu1 %682, %v228_v3   ;;  %335 = vperm.xlu0 %686, %v226_v6   ;;  %p703_p3 = pnand %p702_p2, %p696_p13 }
  0x22   : > { %683 = vset.pattern.permute.xlu1 %v757_v4  ;;  %689 = vset.pattern.permute.xlu0 %v757_v4 }
  0x23   : > { %245 = vperm.xlu0 %689, %v227_v0   ;;  %235 = vperm.xlu1 %683, %v225_v7  }
  0x27   : > { %250 = vperm.xlu0 %689, %v228_v3   ;;  %684 = vset.pattern.permute.xlu1 %v756_v2 }
  0x28   : > { %281 = vperm.xlu1 %684, %v225_v7  }
  0x2b   : > { %240 = vperm.xlu0 %689, %v226_v6  }
  0x2c   : > { %285 = vperm.xlu1 %684, %v226_v6  }
  0x2f   : > { %442 = vperm.xlu0 %689, %v231_v8  }
  0x30   : > { %687 = vset.pattern.permute.xlu1 %v755_v1 }
  0x31   : > { %393 = vperm.xlu1 %687, %v228_v3  }
  0x33   : > { %437 = vperm.xlu0 %689, %v230_v9  }
  0x35   : > { %688 = vset.pattern.permute.xlu1 %v758_v5 }
  0x36   : > { %331 = vperm.xlu1 %688, %v225_v7  }
  0x37   : > { %481 = vperm.xlu0 %689, %v469_v10  }
  0x3a   : > { %690 = vset.pattern.permute.xlu1 %v755_v1 }
  0x3b   : > { %381 = vperm.xlu1 %690, %v225_v7  }
  0x3f   : > { %385 = vperm.xlu1 %690, %v226_v6  }
  0x43   : > { %691 = vset.pattern.permute.xlu1 %v757_v4 }
  0x44   : > { %447 = vperm.xlu1 %691, %v232_v11  }
  0x48   : > { %432 = vperm.xlu1 %691, %v229_v12  }
  0x4c   : > { %476 = vperm.xlu1 %691, %v468_v13  }
  0x90   : > { %v290_v14 = vpop.permute.xlu1 %289  ;;  %v390_v15 = vpop.permute.xlu0 %389 }
  0x91   : > { %v318_v51 = vmul.f32 %v309_v41, %v290_v14  ;;  %v319_v52 = vmul.f32 %v313_v42, %v290_v14  ;;  %v418_v5 = vmul.f32 %v409_v55, %v390_v15  ;;  %v419_v6 = vmul.f32 %v413_v56, %v390_v15 }
  0x94   : > { %v294_v16 = vpop.permute.xlu1 %293 }
  0x95   : > { %v340_v17 = vpop.permute.xlu0 %339  ;;  %v320_v9 = vmul.f32 %v309_v41, %v294_v16  ;;  %v321_v10 = vmul.f32 %v313_v42, %v294_v16 }
  0x96   : > { %v368_v57 = vmul.f32 %v359_v53, %v340_v17  ;;  %v369_v58 = vmul.f32 %v363_v54, %v340_v17 }
  0x99   : > { %v871_v18 = vpop.permute.xlu1 %343  ;;  %v336_v22 = vpop.permute.xlu0 %335 }
  0x9a   : > { %v366_v14 = vmul.f32 %v359_v53, %v336_v22  ;;  %v367_v17 = vmul.f32 %v363_v54, %v336_v22  ;;  %v370_v28 = vmul.f32 %v359_v53, %v871_v18 }
  0x9e   : > { %v236_v20 = vpop.permute.xlu1 %235  ;;  %v246_v29 = vpop.permute.xlu0 %245 }
  0x9f   : > { %v276_v49 = vmul.f32 %v267_v39, %v246_v29  ;;  %v277_v50 = vmul.f32 %v271_v40, %v246_v29  ;;  %v272_v19 = vmul.f32 %v267_v39, %v236_v20  ;;  %v273_v21 = vmul.f32 %v271_v40, %v236_v20 }
  0xa0   : > { %v371_v29 = vmul.f32 %v363_v54, %v871_v18 }
  0xa1   : > { %v326_v59 = vadd.f32 %v318_v51, %v276_v49  ;;  %v327_v60 = vadd.f32 %v319_v52, %v277_v50 }
  0xa2   : > { %v251_v45 = vpop.permute.xlu0 %250 }
  0xa3   : > { %v282_v27 = vpop.permute.xlu1 %281  ;;  %v278_v63 = vmul.f32 %v267_v39, %v251_v45  ;;  %v279_v0 = vmul.f32 %v271_v40, %v251_v45  ;;  %v376_v7 = vadd.f32 %v368_v57, %v326_v59  ;;  %v377_v8 = vadd.f32 %v369_v58, %v327_v60 }
  0xa4   : > { %v314_v11 = vmul.f32 %v309_v41, %v282_v27  ;;  %v315_v12 = vmul.f32 %v313_v42, %v282_v27 }
  0xa5   : > { %v328_v23 = vadd.f32 %v320_v9, %v278_v63  ;;  %v329_v24 = vadd.f32 %v321_v10, %v279_v0  ;;  %v426_v15 = vadd.f32 %v418_v5, %v376_v7  ;;  %v427_v30 = vadd.f32 %v419_v6, %v377_v8  ;;  %v692_v9 = vld [vmem:[%s934_s3] sm:$0xff]  }
  0xa6   : > { %v241_v61 = vpop.permute.xlu0 %240  ;;  %v322_v31 = vadd.f32 %v314_v11, %v272_v19  ;;  %v323_v32 = vadd.f32 %v315_v12, %v273_v21 }
  0xa7   : > { %v286_v36 = vpop.permute.xlu1 %285  ;;  %v274_v1 = vmul.f32 %v267_v39, %v241_v61  ;;  %v275_v2 = vmul.f32 %v271_v40, %v241_v61  ;;  %v378_v39 = vadd.f32 %v370_v28, %v328_v23  ;;  %v379_v40 = vadd.f32 %v371_v29, %v329_v24 }
  0xa8   : > { %v316_v3 = vmul.f32 %v309_v41, %v286_v36  ;;  %v317_v4 = vmul.f32 %v313_v42, %v286_v36 }
  0xaa   : > { %v324_v25 = vadd.f32 %v316_v3, %v274_v1  ;;  %v325_v26 = vadd.f32 %v317_v4, %v275_v2  ;;  %v443_v16 = vpop.permute.xlu0 %442 }
  0xab   : > { %v454_v41 = vadd.f32 %v443_v16, %v426_v15  ;;  %v455_v42 = vadd.f32 %v443_v16, %v427_v30 }
  0xac   : > { %v394_v48 = vpop.permute.xlu1 %393  ;;  %v374_v37 = vadd.f32 %v366_v14, %v324_v25  ;;  %v375_v38 = vadd.f32 %v367_v17, %v325_v26 }
  0xad   : > { %v420_v33 = vmul.f32 %v409_v55, %v394_v48  ;;  %v421_v27 = vmul.f32 %v413_v56, %v394_v48  ;;  %v463_v59 = vmax.f32 %v455_v42, 0.0 }
  0xaf   : > { %v428_v46 = vadd.f32 %v420_v33, %v378_v39  ;;  %v429_v47 = vadd.f32 %v421_v27, %v379_v40 }
  0xb1   : > { %v332_v62 = vpop.permute.xlu1 %331 }
  0xb2   : > { %v364_v35 = vmul.f32 %v359_v53, %v332_v62  ;;  %v365_v22 = vmul.f32 %v363_v54, %v332_v62  ;;  %v462_v53 = vmax.f32 %v454_v41, 0.0  ;;  %v438_v54 = vpop.permute.xlu0 %437 }
  0xb4   : > { %v372_v49 = vadd.f32 %v364_v35, %v322_v31  ;;  %v373_v50 = vadd.f32 %v365_v22, %v323_v32 }
  0xb6   : > { %v382_v13 = vpop.permute.xlu1 %381  ;;  %v482_v19 = vpop.permute.xlu0 %481 }
  0xb7   : > { %v414_v43 = vmul.f32 %v409_v55, %v382_v13  ;;  %v415_v18 = vmul.f32 %v413_v56, %v382_v13 }
  0xb9   : > { %v422_v57 = vadd.f32 %v414_v43, %v372_v49  ;;  %v423_v58 = vadd.f32 %v415_v18, %v373_v50 }
  0xba   : > { %v386_v34 = vpop.permute.xlu1 %385 }
  0xbb   : > { %v416_v36 = vmul.f32 %v409_v55, %v386_v34  ;;  %v417_v20 = vmul.f32 %v413_v56, %v386_v34 }
  0xbd   : > { %v424_v44 = vadd.f32 %v416_v36, %v374_v37  ;;  %v425_v45 = vadd.f32 %v417_v20, %v375_v38 }
  0xbf   : > { %v448_v48 = vpop.permute.xlu1 %447  ;;  %v452_v60 = vadd.f32 %v438_v54, %v424_v44  ;;  %v453_v61 = vadd.f32 %v438_v54, %v425_v45 }
  0xc0   : > { %v456_v51 = vadd.f32 %v448_v48, %v428_v46  ;;  %v457_v52 = vadd.f32 %v448_v48, %v429_v47 }
  0xc1   : > { %v461_v5 = vmax.f32 %v453_v61, 0.0  ;;  %v460_v6 = vmax.f32 %v452_v60, 0.0 }
  0xc2   : > { %v464_v62 = vmax.f32 %v456_v51, 0.0  ;;  %v465_v63 = vmax.f32 %v457_v52, 0.0 }
  0xc3   : > { %v433_v55 = vpop.permute.xlu1 %432 }
  0xc4   : > { %v450_v56 = vadd.f32 %v433_v55, %v422_v57  ;;  %v451_v0 = vadd.f32 %v433_v55, %v423_v58  ;;  %v473_v1 = vpack.c.bf16 %v465_v63, %v463_v59  ;;  %v472_v2 = vpack.c.bf16 %v464_v62, %v462_v53 }
  0xc6   : > { %v458_v3 = vmax.f32 %v450_v56, 0.0  ;;  %v459_v4 = vmax.f32 %v451_v0, 0.0  ;;  %505 = vmatprep.subr.bf16.mxu0 %v473_v1 }
  0xc7   : > { %506 = vmatpush1.bf16.msra.mxu0 %v472_v2  ;;  %v477_v10 = vpop.permute.xlu1 %476 }
  0xc8   : > { %v471_v7 = vpack.c.bf16 %v461_v5, %v459_v4  ;;  %v470_v8 = vpack.c.bf16 %v460_v6, %v458_v3 }
  0xca   : > { %507 = vmatprep.subr.bf16.mxu0 %v471_v7 }
  0xcb   : > { %508 = vmatpush1.bf16.msra.mxu0 %v470_v8 }
  0xce   : > { %628 = vmatmul.mubr.msk.bf16.vlgmr.msra.gmra.mxu0 %vm489_vm0, %v692_v9 }
 0x18e   : > { %v527_v11 = vpop.f32.mrf.mxu0 }
 0x18f   : > { %v528_v12 = vadd.f32 %v527_v11, %v477_v10 }
 0x190   : > { %v529_v13 = vpop.f32.mrf.mxu0 }
 0x191   : > { %v536_v14 = vmax.f32 %v528_v12, 0.0  ;;  %v530_v17 = vadd.f32 %v529_v13, %v477_v10 }
 0x192   : > { %v531_v21 = vpop.f32.mrf.mxu0 }
 0x193   : > { %540 = vst [vmem:[%s217_s23] sm:$0xff] %v536_v14  ;;  %v537_v23 = vmax.f32 %v530_v17, 0.0  ;;  %v532_v24 = vadd.f32 %v531_v21, %v482_v19 }
 0x194   : > { %v533_v25 = vpop.f32.mrf.mxu0 }
 0x195   : > { %541 = vst [vmem:[%s217_s23 + $0x8] sm:$0xff] %v537_v23  ;;  %v538_v26 = vmax.f32 %v532_v24, 0.0  ;;  %v534_v28 = vadd.f32 %v533_v25, %v482_v19 }
 0x197   : > { %542 = vst [vmem:[%s217_s23 + $0x10] sm:$0xff] %v538_v26  ;;  %v539_v29 = vmax.f32 %v534_v28, 0.0 }
 0x199   : > { %543 = vst [vmem:[%s217_s23 + $0x18] sm:$0xff] %v539_v29 }
 0x19a   : > { %706 = shalt.err (!%p703_p3)
}
 0x19b   : > { %s707_s12 = scalar_lea.hbm %s889_s7, 512  ;;  %s711_s15 = scalar_lea.hbm %s936_s5, 1024 }
 0x19c   : > { %p708_p4 = scmp.ne.s32.totalorder %s889_s7, %s707_s12  ;;  %p712_p9 = scmp.lt.s32.totalorder %s889_s7, %s936_s5 }
 0x19d   : > { %p713_p10 = scmp.lt.s32.totalorder %s711_s15, %s707_s12 }
 0x19e   : > { %p709_p7 = pnand %p708_p4, %p830_p5 }
 0x19f   : > { %p714_p11 = por %p713_p10, %p712_p9 }
 0x1a0   : > { %p710_p8 = pneg %p709_p7 }
 0x1a2   : > { %p715_p12 = pnand %p714_p11, %p710_p8 }
 0x1a4   : > { %718 = shalt.err (!%p715_p12)
}
 0x1a5   : > { %s760_s23 = smov 256   ;;  %s761_s26 = smov 16  }
 0x1a6   : > { %636 = dma.vmem_to_hbm [thread:$0]  (%p830_p5), %s884_s25, 512, %s889_s7, %s891_s8, %s760_s23, %s760_s23, %s761_s26  }
 0x1a7 PF: > { %p642_p13 = scmp.ge.s32.totalorder %s753_s21, 2  ;;  %s573_s30 = sand.u32 1, %s741_s18  }
 0x1a8   : > { %s574_s6 = scalar_lea.sflag [#allocation3], %s573_s30 }
 0x1a9   : > { %p639_p0 = pnand %p642_p13, %p834_p6 }
 0x1ab   : > { %p640_p1 = pneg %p639_p0 }
 0x1ad   : > { %736 = dma.done.wait (%p640_p1), %s574_s6, 512  }
 0x1ae   : > { %738 = vsyncadd (%p640_p1), %s574_s6, 4294966784  ;;  %p15_p2 = scmp.ge.s32.totalorder %s817_s24, 4   ;;  %s939_s18 = smov %s745_s19 }
 0x1af   : > { %s940_s19 = smov %s749_s20  ;;  %s941_s20 = smov %s828_s27 }
 0x1b0   : > { %s942_s21 = smov %s817_s24  ;;  %17 = sbr.rel (!%p15_p2) target bundleno = 3 (0x3), region = 75 }
 0x1b5   :  { %579 = vsyncpa [#allocation3], 1 }
 0x1b6   :  { %581 = vsyncpa [#allocation3 + $0x1], 1 }

</bundles_post_ra>
